<compile_context>
chip_gen: v6e
topology: v6e:2x2x1
jax: 0.10.0
libtpu: 0.0.40
codegen_flags: <defaults>
</compile_context>

<pallas_src>
import functools

import jax
import jax.numpy as jnp
from jax.experimental import pallas as pl
from jax.experimental.pallas import tpu as pltpu

EPS = 1e-12
TILE_N = 128  # lane-dense output-channel tile (multiple of 128)


def _round_up(x, m):
    return ((x + m - 1) // m) * m


def _transform_block_kernel(x_ref, wt_ref, gamma_ref, beta_ref, o_ref,
                            *, eps, nonlinear):
    # ---- Linear (MXU): bf16 inputs, f32 accumulation ----
    # NOTE: the Linear bias is intentionally omitted — train-mode BatchNorm
    # subtracts the per-channel batch mean right after, so it cancels exactly.
    y = jnp.dot(x_ref[...], wt_ref[...], preferred_element_type=jnp.float32)

    # ---- BatchNorm1d (train-mode batch stats, biased variance), fused ----
    mean = jnp.mean(y, axis=0, keepdims=True)                       # (1, tn)
    var = jnp.mean(jnp.square(y - mean), axis=0, keepdims=True)     # (1, tn)
    scale = gamma_ref[...] * jax.lax.rsqrt(var + eps)               # (1, tn)
    shift = beta_ref[...] - mean * scale                            # (1, tn)
    out = y * scale + shift                                         # one FMA / elem

    # ---- Optional nonlinearity ----
    if nonlinear == "relu":
        out = jnp.maximum(out, 0.0)
    elif nonlinear == "tanh":
        out = jnp.tanh(out)
    elif nonlinear is not None:
        raise ValueError(f"unsupported nonlinear: {nonlinear}")

    o_ref[...] = out.astype(o_ref.dtype)


def prepare_params(weight, gamma, beta, *, tile_n=TILE_N):
    """One-time (parameter-init) preparation: transpose, pad to a lane-dense
    multiple of 128 output channels, cast weight to bf16 for the MXU.

    Args:
      weight: (out_channels, in_channels)  -- PyTorch nn.Linear.weight layout
      gamma:  (out_channels,)              -- BatchNorm1d.weight
      beta:   (out_channels,)              -- BatchNorm1d.bias
    Returns:
      (wt_pad, gamma_pad, beta_pad, out_channels)
    """
    out_ch, in_ch = weight.shape
    n_pad = _round_up(out_ch, tile_n)

    wt_pad = jnp.zeros((in_ch, n_pad), dtype=jnp.bfloat16)
    wt_pad = wt_pad.at[:, :out_ch].set(jnp.asarray(weight).T.astype(jnp.bfloat16))
    # Padded channels: y == 0 for all rows -> var == 0 -> out == 0 (finite).
    gamma_pad = jnp.ones((1, n_pad), dtype=jnp.float32)
    gamma_pad = gamma_pad.at[:, :out_ch].set(jnp.asarray(gamma, jnp.float32))
    beta_pad = jnp.zeros((1, n_pad), dtype=jnp.float32)
    beta_pad = beta_pad.at[:, :out_ch].set(jnp.asarray(beta, jnp.float32))
    return wt_pad, gamma_pad, beta_pad, out_ch


def transform_block_1d(x, wt_pad, gamma_pad, beta_pad, out_channels,
                       *, eps=EPS, nonlinear="relu", tile_n=TILE_N):
    """Forward pass of TransformBlock1d on prepared (padded) parameters.

    Args:
      x:            (batch, in_channels) float32
      wt_pad:       (in_channels, n_pad) bfloat16, n_pad % 128 == 0
      gamma_pad:    (1, n_pad) float32
      beta_pad:     (1, n_pad) float32
      out_channels: true number of output channels (<= n_pad)
    Returns:
      (batch, out_channels) float32
    """
    batch, in_ch = x.shape
    n_pad = wt_pad.shape[1]
    assert wt_pad.shape[0] == in_ch and n_pad % tile_n == 0

    # bf16 activations into the MXU (halves activation DMA, native MXU format);
    # accumulation and all BN math remain f32 inside the kernel.
    x_bf16 = x.astype(jnp.bfloat16)

    kernel = functools.partial(_transform_block_kernel, eps=eps, nonlinear=nonlinear)

    grid = (n_pad // tile_n,)
    cost = pl.CostEstimate(
        flops=2 * batch * in_ch * n_pad,
        transcendentals=(batch * n_pad if nonlinear == "tanh" else 0) + n_pad,
        bytes_accessed=(batch * in_ch * 2              # x (bf16)
                        + in_ch * n_pad * 2            # Wt (bf16)
                        + 2 * n_pad * 4                # gamma, beta
                        + batch * n_pad * 4),          # out (f32)
    )

    out_pad = pl.pallas_call(
        kernel,
        out_shape=jax.ShapeDtypeStruct((batch, n_pad), jnp.float32),
        grid=grid,
        in_specs=[
            pl.BlockSpec((batch, in_ch), lambda j: (0, 0)),   # full x, resident
            pl.BlockSpec((in_ch, tile_n), lambda j: (0, j)),  # Wt column slab
            pl.BlockSpec((1, tile_n), lambda j: (0, j)),      # gamma slab
            pl.BlockSpec((1, tile_n), lambda j: (0, j)),      # beta slab
        ],
        out_specs=pl.BlockSpec((batch, tile_n), lambda j: (0, j)),
        compiler_params=pltpu.CompilerParams(
            dimension_semantics=("parallel",)),
        cost_estimate=cost,
    )(x_bf16, wt_pad, gamma_pad, beta_pad)

    return out_pad[:, :out_channels]


def _reference(x, weight, bias, gamma, beta, *, eps=EPS, nonlinear="relu"):
    y = x @ weight.T + bias
    mean = jnp.mean(y, axis=0, keepdims=True)
    var = jnp.mean((y - mean) ** 2, axis=0, keepdims=True)
    y = (y - mean) / jnp.sqrt(var + eps)
    y = gamma * y + beta
    if nonlinear == "relu":
        y = jnp.maximum(y, 0.0)
    elif nonlinear == "tanh":
        y = jnp.tanh(y)
    return y


if __name__ == "__main__":
    # Small, deterministic shapes consistent with the module's forward:
    # input (batch_size, in_channels) -> output (batch_size, out_channels).
    batch, in_channels, out_channels = 8, 32, 64

    key = jax.random.PRNGKey(0)
    kx, kw, kb = jax.random.split(key, 3)

    x = jax.random.normal(kx, (batch, in_channels), dtype=jnp.float32)

    # Deterministic parameter init (matches nn.Linear's uniform bound 1/sqrt(fan_in)).
    bound = 1.0 / (in_channels ** 0.5)
    weight = jax.random.uniform(kw, (out_channels, in_channels),
                                minval=-bound, maxval=bound, dtype=jnp.float32)
    bias = jax.random.uniform(kb, (out_channels,),
                              minval=-bound, maxval=bound, dtype=jnp.float32)
    gamma = jnp.ones((out_channels,), dtype=jnp.float32)   # BatchNorm1d.weight
    beta = jnp.zeros((out_channels,), dtype=jnp.float32)   # BatchNorm1d.bias

    # One-time parameter preparation (transpose + pad + bf16 cast).
    # The Linear bias is accepted by the module but is cancelled exactly by
    # train-mode BatchNorm, so it is not fed to the kernel.
    wt_pad, gamma_pad, beta_pad, n_out = prepare_params(weight, gamma, beta)

    out = transform_block_1d(x, wt_pad, gamma_pad, beta_pad, n_out,
                             nonlinear="relu")
    out = jax.block_until_ready(out)

    ref = _reference(x, weight, bias, gamma, beta, nonlinear="relu")
    assert out.shape == (batch, out_channels)
    # bf16 matmul inputs (f32 accumulation) -> allow ~1e-2-level deviation.
    assert jnp.allclose(out, ref, atol=3e-2, rtol=3e-2), "mismatch vs JAX reference"

    print("KERNEL_OK")
</pallas_src>

<mosaic_0001>
module attributes {stable_mosaic.version = 11 : i64} {
  func.func @_transform_block_kernel(%arg0: i32, %arg1: memref<8x32xbf16, #tpu.memory_space<vmem>>, %arg2: memref<32x128xbf16, #tpu.memory_space<vmem>>, %arg3: memref<1x128xf32, #tpu.memory_space<vmem>>, %arg4: memref<1x128xf32, #tpu.memory_space<vmem>>, %arg5: memref<8x128xf32, #tpu.memory_space<vmem>>) attributes {dimension_semantics = [#tpu.dimension_semantics<parallel>], iteration_bounds = array<i64: 1>, scalar_prefetch = 0 : i64, scratch_operands = 0 : i64, tpu.core_type = #tpu.core_type<tc>, window_params = [{pipeline_mode = #tpu.pipeline_mode<synchronous>, transform_indices = @transform_0, window_bounds = array<i64: 8, 32>}, {transform_indices = @transform_1, window_bounds = array<i64: 32, 128>}, {transform_indices = @transform_2, window_bounds = array<i64: 1, 128>}, {transform_indices = @transform_3, window_bounds = array<i64: 1, 128>}, {transform_indices = @transform_4, window_bounds = array<i64: 8, 128>}]} {
    %c0 = arith.constant 0 : index
    %c0_0 = arith.constant 0 : index
    %0 = vector.load %arg1[%c0, %c0_0] : memref<8x32xbf16, #tpu.memory_space<vmem>>, vector<8x32xbf16>
    %c0_1 = arith.constant 0 : index
    %c0_2 = arith.constant 0 : index
    %1 = vector.load %arg2[%c0_1, %c0_2] : memref<32x128xbf16, #tpu.memory_space<vmem>>, vector<32x128xbf16>
    %cst = arith.constant dense<0.000000e+00> : vector<8x128xf32>
    %2 = tpu.matmul %0, %1, %cst {dimension_numbers = #tpu.dot_dimension_numbers<[1], [0], [0], [1], [0, 0, 1, 1], [], []>} : vector<8x32xbf16>, vector<32x128xbf16>, vector<8x128xf32> -> vector<8x128xf32>
    %cst_3 = arith.constant dense<0.000000e+00> : vector<128xf32>
    %3 = vector.multi_reduction <add>, %2, %cst_3 [0] : vector<8x128xf32> to vector<128xf32>
    %4 = vector.shape_cast %3 : vector<128xf32> to vector<1x128xf32>
    %cst_4 = arith.constant 8.000000e+00 : f32
    %5 = vector.broadcast %cst_4 : f32 to vector<1x128xf32>
    %6 = arith.divf %4, %5 : vector<1x128xf32>
    %7 = vector.broadcast %6 : vector<1x128xf32> to vector<8x128xf32>
    %8 = arith.subf %2, %7 : vector<8x128xf32>
    %9 = arith.mulf %8, %8 : vector<8x128xf32>
    %cst_5 = arith.constant dense<0.000000e+00> : vector<128xf32>
    %10 = vector.multi_reduction <add>, %9, %cst_5 [0] : vector<8x128xf32> to vector<128xf32>
    %11 = vector.shape_cast %10 : vector<128xf32> to vector<1x128xf32>
    %cst_6 = arith.constant 8.000000e+00 : f32
    %12 = vector.broadcast %cst_6 : f32 to vector<1x128xf32>
    %13 = arith.divf %11, %12 : vector<1x128xf32>
    %c0_7 = arith.constant 0 : index
    %c0_8 = arith.constant 0 : index
    %14 = vector.load %arg3[%c0_7, %c0_8] : memref<1x128xf32, #tpu.memory_space<vmem>>, vector<1x128xf32>
    %cst_9 = arith.constant 9.99999996E-13 : f32
    %15 = vector.broadcast %cst_9 : f32 to vector<1x128xf32>
    %16 = arith.addf %13, %15 : vector<1x128xf32>
    %17 = math.rsqrt %16 : vector<1x128xf32>
    %18 = arith.mulf %14, %17 : vector<1x128xf32>
    %c0_10 = arith.constant 0 : index
    %c0_11 = arith.constant 0 : index
    %19 = vector.load %arg4[%c0_10, %c0_11] : memref<1x128xf32, #tpu.memory_space<vmem>>, vector<1x128xf32>
    %20 = arith.mulf %6, %18 : vector<1x128xf32>
    %21 = arith.subf %19, %20 : vector<1x128xf32>
    %22 = vector.broadcast %18 : vector<1x128xf32> to vector<8x128xf32>
    %23 = arith.mulf %2, %22 : vector<8x128xf32>
    %24 = vector.broadcast %21 : vector<1x128xf32> to vector<8x128xf32>
    %25 = arith.addf %23, %24 : vector<8x128xf32>
    %cst_12 = arith.constant 0.000000e+00 : f32
    %26 = vector.broadcast %cst_12 : f32 to vector<8x128xf32>
    %27 = arith.maximumf %25, %26 : vector<8x128xf32>
    %c0_13 = arith.constant 0 : index
    %c0_14 = arith.constant 0 : index
    %28 = vector.load %arg5[%c0_13, %c0_14] : memref<8x128xf32, #tpu.memory_space<vmem>>, vector<8x128xf32>
    tpu.vector_store %arg5[%c0_13, %c0_14], %27 {strides = array<i32>} : memref<8x128xf32, #tpu.memory_space<vmem>>, vector<8x128xf32>,
    return
  }
  func.func @transform_0(%arg0: i32) -> (i32, i32) {
    %c0_i32 = arith.constant 0 : i32
    %c0_i32_0 = arith.constant 0 : i32
    %c0_i32_1 = arith.constant 0 : i32
    return %c0_i32, %c0_i32_0 : i32, i32
  }
  func.func @transform_1(%arg0: i32) -> (i32, i32) {
    %c0_i32 = arith.constant 0 : i32
    %c0_i32_0 = arith.constant 0 : i32
    return %c0_i32, %arg0 : i32, i32
  }
  func.func @transform_2(%arg0: i32) -> (i32, i32) {
    %c0_i32 = arith.constant 0 : i32
    %c0_i32_0 = arith.constant 0 : i32
    return %c0_i32, %arg0 : i32, i32
  }
  func.func @transform_3(%arg0: i32) -> (i32, i32) {
    %c0_i32 = arith.constant 0 : i32
    %c0_i32_0 = arith.constant 0 : i32
    return %c0_i32, %arg0 : i32, i32
  }
  func.func @transform_4(%arg0: i32) -> (i32, i32) {
    %c0_i32 = arith.constant 0 : i32
    %c0_i32_0 = arith.constant 0 : i32
    return %c0_i32, %arg0 : i32, i32
  }
}

</mosaic_0001>

<bundles_post_ra>
// kernel: tpu_custom_call.1
= control target key start
LH: loop header
LB: loop body
LE: loop exit
PB: predicated region body
PF: predicated region fallthrough
CT: control target
= control target key end

     0   :  { %9 = vsyncpa [#allocation3], 0  ;;  %s300_s0 = inlined_call_operand.hbm [shape: bf16[8,32], index: 0, kind: input, shape index: {}]   ;;  %s301_s1 = inlined_call_operand.hbm [shape: bf16[32,128], index: 1, kind: input, shape index: {}]   ;;  %s302_s2 = inlined_call_operand.vmem [shape: f32[1,128], index: 2, kind: input, shape index: {}]   ;;  %s303_s3 = inlined_call_operand.vmem [shape: f32[1,128], index: 3, kind: input, shape index: {}]   ;;  %s304_s4 = inlined_call_operand.hbm [shape: f32[8,128], index: 4, kind: output, shape index: {}]  }
   0x1   :  { %10 = vsyncpa [#allocation6], 0 }
   0x2   :  { %11 = vsyncpa [#allocation4], 0  ;;  %s253_s15 = smov [#allocation2]   ;;  %s254_s17 = smov [#allocation5]  }
   0x3   :  { %s18_s16 = sshll.u32 %s253_s15, 4  ;;  %s27_s18 = sshll.u32 %s254_s17, 4  ;;  %s19_s16 = int_to_ptr.vmem [resolvable:$true] %s18_s16  ;;  %s28_s18 = int_to_ptr.vmem [resolvable:$true] %s27_s18 }
   0x4   :  { %s195_s19 = scalar_lea.vmem %s19_s16, 64  ;;  %p200_p1 = scmp.lt.s32.totalorder %s19_s16, %s19_s16 }
   0x5   :  { %p196_p0 = scmp.ne.s32.totalorder %s19_s16, %s195_s19  ;;  %p201_p2 = scmp.lt.s32.totalorder %s195_s19, %s195_s19 }
   0x7   :  { %p202_p3 = por %p201_p2, %p200_p1 }
   0x9   :  { %p203_p4 = pnand %p202_p3, %p196_p0 }
   0xb   :  { %206 = shalt.err (!%p203_p4)
}
   0xc   :  { %21 = dma.hbm_to_vmem [thread:$0]  %s300_s0, 64, %s19_s16, [#allocation3]  }
   0xd   :  { %s215_s22 = scalar_lea.vmem %s28_s18, 256  ;;  %p220_p6 = scmp.lt.s32.totalorder %s28_s18, %s28_s18 }
   0xe   :  { %p216_p5 = scmp.ne.s32.totalorder %s28_s18, %s215_s22  ;;  %p221_p7 = scmp.lt.s32.totalorder %s215_s22, %s215_s22 }
  0x10   :  { %p222_p8 = por %p221_p7, %p220_p6 }
  0x12   :  { %p223_p9 = pnand %p222_p8, %p216_p5 }
  0x14   :  { %226 = shalt.err (!%p223_p9)
}
  0x15   :  { %s255_s23 = smov 64   ;;  %s256_s24 = smov 4  }
  0x16   :  { %33 = dma.hbm_to_vmem [thread:$0]  %s301_s1, 256, %s28_s18, [#allocation6], %s255_s23, %s255_s23, %s256_s24  }
  0x17   :  { %247 = dma.done.wait [#allocation3], 64  }
  0x18   :  { %248 = vsyncadd [#allocation3], 4294967232 }
  0x19   :  { %249 = dma.done.wait [#allocation6], 256  }
  0x1a   :  { %250 = vsyncadd [#allocation6], 4294967040  ;;  %v257_v0 = vmov 0.0   ;;  %vm258_vm0 = vmmov 0   ;;  %v183_v1 = vld [vmem:[#allocation5 + $0x8] sm:$0xff]   ;;  %v184_v2 = vld [vmem:[#allocation5] sm:$0xff]   ;;  %v131_v25 = vlaneseq }
  0x1b   :  { %168 = vmatprep.subr.bf16.mxu0 %v257_v0  ;;  %172 = vmatprep.mubr.msk.bf16.mxu0 %vm258_vm0, %v257_v0  ;;  %v45_v3 = vld [vmem:[#allocation2] sm:$0xf]  ;;  %vm62_vm1 = vcmask 261120   ;;  %s259_s29 = smov [#allocation7]  }
  0x1c   :  { %169 = vmatpush3.bf16.msra.mxu0 %v183_v1  ;;  %v132_v26 = vshrl.u32 %v131_v25, 7  ;;  %v123_v27 = vld [vmem:[%s302_s2] sm:$0x1]  ;;  %s152_s30 = sshll.u32 %s259_s29, 4  ;;  %s153_s30 = int_to_ptr.vmem [resolvable:$true] %s152_s30 }
  0x1d   :  { %170 = vmatprep.subr.bf16.mxu0 %v257_v0  ;;  %v127_v31 = vld [vmem:[%s303_s3] sm:$0x1]  ;;  %s227_s5 = scalar_lea.vmem %s153_s30, 128  ;;  %p232_p11 = scmp.lt.s32.totalorder %s153_s30, %s153_s30 }
  0x1e   :  { %v133_v28 = vsub.s32 0, %v132_v26  ;;  %p228_p10 = scmp.ne.s32.totalorder %s153_s30, %s227_s5  ;;  %p233_p12 = scmp.lt.s32.totalorder %s227_s5, %s227_s5 }
  0x20   :  { %171 = vmatpush3.bf16.msra.mxu0 %v184_v2  ;;  %p234_p13 = por %p233_p12, %p232_p11 }
  0x22   :  { %p235_p0 = pnand %p234_p13, %p228_p10 }
  0x23   :  { %173 = vmatmul.mubr.msk.bf16.vlgmr.msra.gmra.mxu0 %vm62_vm1, %v45_v3 }
  0xe3   :  { %v100_v4 = vpop.f32.mrf.mxu0 }
  0xe4   :  { %v106_v5 = vrot.slane %v100_v4, 4 }
  0xe5   :  { %v174_v6 = vpop.f32.mrf.mxu0 }
  0xe6   :  { %v107_v7 = vadd.f32 %v106_v5, %v100_v4 }
  0xe7   :  { %v103_v8 = vpop.f32.mrf.mxu0 }
  0xe8   :  { %v108_v9 = vrot.slane %v107_v7, 2 }
  0xe9   :  { %v175_v10 = vpop.f32.mrf.mxu0 }
  0xea   :  { %v109_v11 = vadd.f32 %v108_v9, %v107_v7 }
  0xec   :  { %v110_v12 = vrot.slane %v109_v11, 1 }
  0xee   :  { %v111_v13 = vadd.f32 %v110_v12, %v109_v11 }
  0xf0   :  { %v113_v14 = vmul.f32 0.125, %v111_v13 }
  0xf2   :  { %v114_v15 = vsub.f32 %v100_v4, %v113_v14 }
  0xf4   :  { %v115_v16 = vmul.f32 %v114_v15, %v114_v15 }
  0xf6   :  { %v116_v17 = vrot.slane %v115_v16, 4 }
  0xf8   :  { %v117_v18 = vadd.f32 %v116_v17, %v115_v16 }
  0xfa   :  { %v118_v19 = vrot.slane %v117_v18, 2 }
  0xfc   :  { %v119_v20 = vadd.f32 %v118_v19, %v117_v18 }
  0xfe   :  { %v120_v21 = vrot.slane %v119_v20, 1 }
 0x100   :  { %v121_v22 = vadd.f32 %v120_v21, %v119_v20 }
 0x102   :  { %v122_v23 = vmul.f32 0.125, %v121_v22 }
 0x104   :  { %v124_v24 = vadd.f32 1e-12, %v122_v23 }
 0x106   :  { %185 = vrsqrt.f32 %v124_v24 }
 0x113   :  { %v186_v29 = vpop.eup %185 }
 0x114   :  { %v126_v30 = vmul.f32 %v186_v29, %v123_v27 }
 0x116   :  { %v128_v32 = vmul.f32 %v126_v30, %v113_v14  ;;  %v134_v33 = vrot.slane %v126_v30, %v133_v28 }
 0x118   :  { %v129_v34 = vsub.f32 %v127_v31, %v128_v32  ;;  %v136_v35 = vmul.f32 %v134_v33, %v100_v4 }
 0x11a   :  { %v141_v36 = vrot.slane %v129_v34, %v133_v28 }
 0x11c   :  { %v143_v37 = vadd.f32 %v141_v36, %v136_v35 }
 0x11e   :  { %v144_v38 = vmax.f32 %v143_v37, 0.0 }
 0x120   :  { %145 = vst [vmem:[#allocation7] sm:$0xff] %v144_v38 }
 0x121   :  { %238 = shalt.err (!%p235_p0)
}
 0x122   :  { %155 = dma.vmem_to_hbm [thread:$0]  %s153_s30, 128, %s304_s4, [#allocation4]  }
 0x123   :  { %251 = dma.done.wait [#allocation4], 128  }
 0x124   :  { %252 = vsyncadd [#allocation4], 4294967168 }
 0x125   :  { %159 = vsyncpa [#allocation3], 1 }
 0x126   :  { %160 = vsyncpa [#allocation6], 1 }
 0x127   :  { %161 = vsyncpa [#allocation4], 1 }

</bundles_post_ra>
